<compile_context>
chip_gen: v7x
topology: tpu7x:2x2x1
jax: 0.10.0
libtpu: 0.0.40
codegen_flags: <defaults>
</compile_context>

<pallas_src>
import functools

import jax
import jax.numpy as jnp
from jax import lax
from jax.experimental import pallas as pl
from jax.experimental.pallas import tpu as pltpu


def _temporal_block_kernel(x_ref, w1_ref, b1_ref, w2_ref, b2_ref, *rest,
                           K, dilation, pad, padr, TL, has_ds):
    """One (batch, time-tile): conv1+relu -> conv2+relu -> +residual -> relu."""
    if has_ds:
        wd_ref, bd_ref, o_ref, xw_ref, hw_ref = rest
    else:
        o_ref, xw_ref, hw_ref = rest

    t = pl.program_id(1)
    Ci = x_ref.shape[1]            # padded C_in  (multiple of 16)
    Co = o_ref.shape[1]            # padded C_out (multiple of 16)
    x = x_ref[0]                   # (Ci, TL), bf16

    # ---- causal halo handling (pad > 0 iff K > 1) ---------------------------
    # Window layout: [ ...unused... | pad halo cols | TL tile cols ]
    #                 0         PADR-pad         PADR          PADR+TL
    # NOTE: this in-place carry relies on the time axis staying sequential per
    # core ("arbitrary") and on scratch persisting across grid steps.
    if pad > 0:
        @pl.when(t == 0)           # new batch element: zero causal history
        def _():
            xw_ref[:, padr - pad:padr] = jnp.zeros((Ci, pad), xw_ref.dtype)
            hw_ref[:, padr - pad:padr] = jnp.zeros((Co, pad), hw_ref.dtype)

        @pl.when(t > 0)            # carry last `pad` cols of the previous tile
        def _():
            xw_ref[:, padr - pad:padr] = xw_ref[:, padr + TL - pad:padr + TL]
            hw_ref[:, padr - pad:padr] = hw_ref[:, padr + TL - pad:padr + TL]

        # 128-lane-aligned, lane-dense store of the new x tile into the window.
        xw_ref[:, padr:padr + TL] = x

    # ---- conv1: K accumulated MXU dots over shifted windows (bf16, f32 acc) --
    # (For very small channel counts a fused K*Ci im2col contraction would
    #  raise MXU occupancy, but the kernel is staging/memory bound there, so
    #  the copy-free K-dot form is used unconditionally.)
    acc1 = jnp.dot(w1_ref[K - 1], x, preferred_element_type=jnp.float32)
    for j in range(K - 1):
        off = padr - pad + j * dilation
        acc1 = acc1 + jnp.dot(w1_ref[j], xw_ref[:, off:off + TL],
                              preferred_element_type=jnp.float32)
    h32 = jnp.maximum(acc1 + b1_ref[...], 0.0)
    h = h32.astype(jnp.bfloat16)
    # TODO(synk): dropout1/dropout2 are identity (eval semantics); training-mode
    # dropout with the pltpu PRNG is not implemented.

    # ---- conv2: same scheme on h with its own halo window ---------------------
    if pad > 0:
        hw_ref[:, padr:padr + TL] = h
    acc2 = jnp.dot(w2_ref[K - 1], h, preferred_element_type=jnp.float32)
    for j in range(K - 1):
        off = padr - pad + j * dilation
        acc2 = acc2 + jnp.dot(w2_ref[j], hw_ref[:, off:off + TL],
                              preferred_element_type=jnp.float32)
    out2 = jnp.maximum(acc2 + b2_ref[...], 0.0)

    # ---- residual (1x1 downsample conv, or identity) + final ReLU -------------
    # NOTE: residual uses the bf16 copy of x (precision-only gap vs PyTorch f32).
    if has_ds:
        res = jnp.dot(wd_ref[...], x, preferred_element_type=jnp.float32) + bd_ref[...]
    else:
        res = x.astype(jnp.float32)
    o_ref[0] = jnp.maximum(out2 + res, 0.0).astype(o_ref.dtype)


def temporal_block(x, w1, b1, w2, b2, wd, bd, *,
                   kernel_size, stride, dilation, padding,
                   time_tile=1024, out_dtype=jnp.float32):
    """x: (N, C_in, L) f32.  w1: (C_out, C_in, K), w2: (C_out, C_out, K),
    wd: (C_out, C_in) or None (identity residual).  Returns (N, C_out, L)."""
    assert stride == 1, "TCN TemporalBlock uses stride=1"
    assert padding == (kernel_size - 1) * dilation, \
        "out + res only shape-checks for causal padding = (K-1)*dilation"
    N, C_in, L = x.shape
    C_out = w1.shape[0]
    K = kernel_size
    pad = padding
    has_ds = wd is not None
    if not has_ds:
        assert C_in == C_out, "identity residual requires n_inputs == n_outputs"

    def rup(a, m):
        return (a + m - 1) // m * m

    # bf16 vreg is (16, 128): pad channels to 16 so tap slabs stay packed.
    Ci_p = rup(C_in, 16)
    Co_p = rup(C_out, 16)
    padr = rup(pad, 128) if pad > 0 else 0      # lane-aligned tile offset in windows

    cdt = jnp.bfloat16                          # MXU operand / HBM output dtype

    TL_min = max(128, rup(pad, 128)) if pad > 0 else 128
    TL = rup(min(max(time_tile, 128), max(L, 128)), 128)
    TL = max(TL, TL_min)

    def vmem_need(tl):
        tile_io = 2 * Ci_p * tl * 2 + 2 * Co_p * tl * 2           # db'd x / out tiles
        weights = 2 * (K * Co_p * Ci_p + K * Co_p * Co_p
                       + (Co_p * Ci_p if has_ds else 0)) * 2      # db'd bf16 weights
        biases = 2 * 3 * Co_p * 4
        windows = (Ci_p + Co_p) * (padr + tl) * 2                 # persistent scratch
        return tile_io + weights + biases + windows

    VMEM_BUDGET = 40 << 20                       # keep v7x's 64 MiB physical happy
    while TL > TL_min and vmem_need(TL) > VMEM_BUDGET:
        TL -= 128
    Lp = rup(L, TL)
    T = Lp // TL
    vmem_limit = int(max(min(vmem_need(TL) + (8 << 20), 64 << 20), 32 << 20))

    xp = x.astype(jnp.float32)
    if (Ci_p, Lp) != (C_in, L):                  # only pad when actually needed
        xp = jnp.pad(xp, ((0, 0), (0, Ci_p - C_in), (0, Lp - L)))
    xp = xp.astype(cdt)

    # Per-tap weight slabs: w1f[j, co, ci] = w1[co, ci, j] (zero-padded).
    w1f = jnp.zeros((K, Co_p, Ci_p), jnp.float32).at[:, :C_out, :C_in].set(
        jnp.transpose(w1.astype(jnp.float32), (2, 0, 1))).astype(cdt)
    w2f = jnp.zeros((K, Co_p, Co_p), jnp.float32).at[:, :C_out, :C_out].set(
        jnp.transpose(w2.astype(jnp.float32), (2, 0, 1))).astype(cdt)
    b1c = jnp.zeros((Co_p, 1), jnp.float32).at[:C_out, 0].set(b1.astype(jnp.float32))
    b2c = jnp.zeros((Co_p, 1), jnp.float32).at[:C_out, 0].set(b2.astype(jnp.float32))

    ins = [xp, w1f, b1c, w2f, b2c]
    in_specs = [
        pl.BlockSpec((1, Ci_p, TL), lambda n, t: (n, 0, t)),        # x tile
        pl.BlockSpec((K, Co_p, Ci_p), lambda n, t: (0, 0, 0)),      # w1 (resident)
        pl.BlockSpec((Co_p, 1), lambda n, t: (0, 0)),               # b1
        pl.BlockSpec((K, Co_p, Co_p), lambda n, t: (0, 0, 0)),      # w2 (resident)
        pl.BlockSpec((Co_p, 1), lambda n, t: (0, 0)),               # b2
    ]
    if has_ds:
        wdf = jnp.zeros((Co_p, Ci_p), jnp.float32).at[:C_out, :C_in].set(
            wd.astype(jnp.float32)).astype(cdt)
        bdc = jnp.zeros((Co_p, 1), jnp.float32).at[:C_out, 0].set(
            bd.astype(jnp.float32))
        ins += [wdf, bdc]
        in_specs += [
            pl.BlockSpec((Co_p, Ci_p), lambda n, t: (0, 0)),        # wd
            pl.BlockSpec((Co_p, 1), lambda n, t: (0, 0)),           # bd
        ]

    kernel = functools.partial(_temporal_block_kernel,
                               K=K, dilation=dilation, pad=pad, padr=padr,
                               TL=TL, has_ds=has_ds)

    grid_spec = pltpu.PrefetchScalarGridSpec(
        num_scalar_prefetch=0,
        grid=(N, T),
        in_specs=in_specs,
        out_specs=pl.BlockSpec((1, Co_p, TL), lambda n, t: (n, 0, t)),
        scratch_shapes=[
            pltpu.VMEM((Ci_p, padr + TL), cdt),   # x window: [unused|halo|tile]
            pltpu.VMEM((Co_p, padr + TL), cdt),   # h window: [unused|halo|tile]
        ],
    )

    # Time tiles carry halos in persistent scratch -> the t axis must stay
    # "arbitrary" (sequential per core); batch axis is megacore-parallel.
    out = pl.pallas_call(
        kernel,
        out_shape=jax.ShapeDtypeStruct((N, Co_p, Lp), cdt),
        grid_spec=grid_spec,
        compiler_params=pltpu.CompilerParams(
            dimension_semantics=("parallel", "arbitrary"),
            vmem_limit_bytes=vmem_limit),
    )(*ins)

    return out[:, :C_out, :L].astype(out_dtype)


# ----------------------------- reference (pure JAX, f32) ---------------------
def _ref_forward(x, w1, b1, w2, b2, wd, bd, *, dilation, padding):
    def causal_conv(inp, w, b):
        y = lax.conv_general_dilated(
            inp, w, window_strides=(1,), padding=[(padding, padding)],
            rhs_dilation=(dilation,),
            dimension_numbers=("NCH", "OIH", "NCH"))
        y = y + b[None, :, None]
        return y[:, :, :-padding] if padding > 0 else y      # Chomp1d

    h = jax.nn.relu(causal_conv(x, w1, b1))
    out = jax.nn.relu(causal_conv(h, w2, b2))
    if wd is None:
        res = x
    else:
        res = lax.conv_general_dilated(
            x, wd[:, :, None], (1,), [(0, 0)],
            dimension_numbers=("NCH", "OIH", "NCH")) + bd[None, :, None]
    return jax.nn.relu(out + res)


# ----------------------------- parameter init --------------------------------
def _weight_norm(v):
    # PyTorch weight_norm (dim=0): w = g * v / ||v||, g initialized to ||v||.
    norm = jnp.sqrt(jnp.sum(v * v, axis=(1, 2), keepdims=True))
    return norm * v / norm


if __name__ == "__main__":
    def run_case(key, N, C_in, C_out, L, K, dilation, with_downsample, time_tile):
        stride = 1
        padding = (K - 1) * dilation
        ks = jax.random.split(key, 7)
        x = jax.random.normal(ks[0], (N, C_in, L), dtype=jnp.float32)
        w1 = _weight_norm(0.1 * jax.random.normal(ks[1], (C_out, C_in, K), jnp.float32))
        b1 = 0.1 * jax.random.normal(ks[2], (C_out,), jnp.float32)
        w2 = _weight_norm(0.1 * jax.random.normal(ks[3], (C_out, C_out, K), jnp.float32))
        b2 = 0.1 * jax.random.normal(ks[4], (C_out,), jnp.float32)
        if with_downsample:
            wd = 0.1 * jax.random.normal(ks[5], (C_out, C_in), jnp.float32)
            bd = 0.1 * jax.random.normal(ks[6], (C_out,), jnp.float32)
        else:
            wd, bd = None, None

        out = temporal_block(x, w1, b1, w2, b2, wd, bd,
                             kernel_size=K, stride=stride, dilation=dilation,
                             padding=padding, time_tile=time_tile)
        out = jax.block_until_ready(out)

        ref = _ref_forward(x, w1, b1, w2, b2, wd, bd,
                           dilation=dilation, padding=padding)
        assert out.shape == ref.shape, (out.shape, ref.shape)
        err = float(jnp.max(jnp.abs(out - ref)))
        # bf16 matmul operands + bf16 output store (f32 accumulate) -> loose tol.
        assert jnp.allclose(out, ref, atol=3e-2, rtol=3e-2), err

    key = jax.random.PRNGKey(0)
    k1, k2, k3 = jax.random.split(key, 3)
    # Downsample path (C_in != C_out), 3 time tiles of 128 (exercises halo carry).
    run_case(k1, N=2, C_in=3, C_out=5, L=300, K=3, dilation=2,
             with_downsample=True, time_tile=128)
    # Identity-residual path (C_in == C_out), 2 time tiles.
    run_case(k2, N=2, C_in=8, C_out=8, L=200, K=3, dilation=4,
             with_downsample=False, time_tile=128)
    # Exact 16-channel padding, single time tile, wider kernel.
    run_case(k3, N=1, C_in=16, C_out=16, L=256, K=5, dilation=1,
             with_downsample=False, time_tile=512)
    print("KERNEL_OK")
</pallas_src>

<mosaic_0001>
module attributes {stable_mosaic.version = 11 : i64} {
  func.func @_temporal_block_kernel(%arg0: i32, %arg1: i32, %arg2: memref<1x16x128xbf16, #tpu.memory_space<vmem>>, %arg3: memref<3x16x16xbf16, #tpu.memory_space<vmem>>, %arg4: memref<16x1xf32, #tpu.memory_space<vmem>>, %arg5: memref<3x16x16xbf16, #tpu.memory_space<vmem>>, %arg6: memref<16x1xf32, #tpu.memory_space<vmem>>, %arg7: memref<16x16xbf16, #tpu.memory_space<vmem>>, %arg8: memref<16x1xf32, #tpu.memory_space<vmem>>, %arg9: memref<1x16x128xbf16, #tpu.memory_space<vmem>>, %arg10: memref<16x256xbf16, #tpu.memory_space<vmem>>, %arg11: memref<16x256xbf16, #tpu.memory_space<vmem>>) attributes {dimension_semantics = [#tpu.dimension_semantics<parallel>, #tpu.dimension_semantics<arbitrary>], iteration_bounds = array<i64: 2, 3>, scalar_prefetch = 0 : i64, scratch_operands = 2 : i64, tpu.core_type = #tpu.core_type<tc>, window_params = [{transform_indices = @transform_0, window_bounds = array<i64: 1, 16, 128>}, {pipeline_mode = #tpu.pipeline_mode<synchronous>, transform_indices = @transform_1, window_bounds = array<i64: 3, 16, 16>}, {pipeline_mode = #tpu.pipeline_mode<synchronous>, transform_indices = @transform_2, window_bounds = array<i64: 16, 1>}, {pipeline_mode = #tpu.pipeline_mode<synchronous>, transform_indices = @transform_3, window_bounds = array<i64: 3, 16, 16>}, {pipeline_mode = #tpu.pipeline_mode<synchronous>, transform_indices = @transform_4, window_bounds = array<i64: 16, 1>}, {pipeline_mode = #tpu.pipeline_mode<synchronous>, transform_indices = @transform_5, window_bounds = array<i64: 16, 16>}, {pipeline_mode = #tpu.pipeline_mode<synchronous>, transform_indices = @transform_6, window_bounds = array<i64: 16, 1>}, {transform_indices = @transform_7, window_bounds = array<i64: 1, 16, 128>}]} {
    %c0 = arith.constant 0 : index
    %c0_0 = arith.constant 0 : index
    %c0_1 = arith.constant 0 : index
    %0 = vector.load %arg2[%c0, %c0_0, %c0_1] : memref<1x16x128xbf16, #tpu.memory_space<vmem>>, vector<1x16x128xbf16>
    %1 = vector.shape_cast %0 : vector<1x16x128xbf16> to vector<16x128xbf16>
    %c0_i32 = arith.constant 0 : i32
    %2 = arith.cmpi eq, %arg1, %c0_i32 : i32
    %3 = arith.extui %2 : i1 to i32
    %c0_i32_2 = arith.constant 0 : i32
    %4 = arith.cmpi ne, %3, %c0_i32_2 : i32
    scf.if %4 {
      %cst_50 = arith.constant 0.000000e+00 : bf16
      %59 = vector.broadcast %cst_50 : bf16 to vector<16x4xbf16>
      %c0_51 = arith.constant 0 : index
      %c124_52 = arith.constant 124 : index
      %60 = vector.load %arg10[%c0_51, %c124_52] : memref<16x256xbf16, #tpu.memory_space<vmem>>, vector<16x4xbf16>
      tpu.vector_store %arg10[%c0_51, %c124_52], %59 {strides = array<i32>} : memref<16x256xbf16, #tpu.memory_space<vmem>>, vector<16x4xbf16>,
      %cst_53 = arith.constant 0.000000e+00 : bf16
      %61 = vector.broadcast %cst_53 : bf16 to vector<16x4xbf16>
      %c0_54 = arith.constant 0 : index
      %c124_55 = arith.constant 124 : index
      %62 = vector.load %arg11[%c0_54, %c124_55] : memref<16x256xbf16, #tpu.memory_space<vmem>>, vector<16x4xbf16>
      tpu.vector_store %arg11[%c0_54, %c124_55], %61 {strides = array<i32>} : memref<16x256xbf16, #tpu.memory_space<vmem>>, vector<16x4xbf16>,
    } else {
    }
    %c0_i32_3 = arith.constant 0 : i32
    %5 = arith.cmpi sgt, %arg1, %c0_i32_3 : i32
    %6 = arith.extui %5 : i1 to i32
    %c0_i32_4 = arith.constant 0 : i32
    %7 = arith.cmpi ne, %6, %c0_i32_4 : i32
    scf.if %7 {
      %c0_50 = arith.constant 0 : index
      %c252 = arith.constant 252 : index
      %59 = vector.load %arg10[%c0_50, %c252] : memref<16x256xbf16, #tpu.memory_space<vmem>>, vector<16x4xbf16>
      %c0_51 = arith.constant 0 : index
      %c124_52 = arith.constant 124 : index
      %60 = vector.load %arg10[%c0_51, %c124_52] : memref<16x256xbf16, #tpu.memory_space<vmem>>, vector<16x4xbf16>
      tpu.vector_store %arg10[%c0_51, %c124_52], %59 {strides = array<i32>} : memref<16x256xbf16, #tpu.memory_space<vmem>>, vector<16x4xbf16>,
      %c0_53 = arith.constant 0 : index
      %c252_54 = arith.constant 252 : index
      %61 = vector.load %arg11[%c0_53, %c252_54] : memref<16x256xbf16, #tpu.memory_space<vmem>>, vector<16x4xbf16>
      %c0_55 = arith.constant 0 : index
      %c124_56 = arith.constant 124 : index
      %62 = vector.load %arg11[%c0_55, %c124_56] : memref<16x256xbf16, #tpu.memory_space<vmem>>, vector<16x4xbf16>
      tpu.vector_store %arg11[%c0_55, %c124_56], %61 {strides = array<i32>} : memref<16x256xbf16, #tpu.memory_space<vmem>>, vector<16x4xbf16>,
    } else {
    }
    %c0_5 = arith.constant 0 : index
    %c128 = arith.constant 128 : index
    %8 = vector.load %arg10[%c0_5, %c128] : memref<16x256xbf16, #tpu.memory_space<vmem>>, vector<16x128xbf16>
    tpu.vector_store %arg10[%c0_5, %c128], %1 {strides = array<i32>} : memref<16x256xbf16, #tpu.memory_space<vmem>>, vector<16x128xbf16>,
    %c2 = arith.constant 2 : index
    %c0_6 = arith.constant 0 : index
    %c0_7 = arith.constant 0 : index
    %9 = vector.load %arg3[%c2, %c0_6, %c0_7] : memref<3x16x16xbf16, #tpu.memory_space<vmem>>, vector<1x16x16xbf16>
    %10 = vector.shape_cast %9 : vector<1x16x16xbf16> to vector<16x16xbf16>
    %cst = arith.constant dense<0.000000e+00> : vector<16x128xf32>
    %11 = tpu.matmul %10, %1, %cst {dimension_numbers = #tpu.dot_dimension_numbers<[1], [0], [0], [1], [0, 0, 1, 1], [], []>} : vector<16x16xbf16>, vector<16x128xbf16>, vector<16x128xf32> -> vector<16x128xf32>
    %c0_8 = arith.constant 0 : index
    %c0_9 = arith.constant 0 : index
    %c0_10 = arith.constant 0 : index
    %12 = vector.load %arg3[%c0_8, %c0_9, %c0_10] : memref<3x16x16xbf16, #tpu.memory_space<vmem>>, vector<1x16x16xbf16>
    %13 = vector.shape_cast %12 : vector<1x16x16xbf16> to vector<16x16xbf16>
    %c0_11 = arith.constant 0 : index
    %c124 = arith.constant 124 : index
    %14 = vector.load %arg10[%c0_11, %c124] : memref<16x256xbf16, #tpu.memory_space<vmem>>, vector<16x128xbf16>
    %cst_12 = arith.constant dense<0.000000e+00> : vector<16x128xf32>
    %15 = tpu.matmul %13, %14, %cst_12 {dimension_numbers = #tpu.dot_dimension_numbers<[1], [0], [0], [1], [0, 0, 1, 1], [], []>} : vector<16x16xbf16>, vector<16x128xbf16>, vector<16x128xf32> -> vector<16x128xf32>
    %16 = arith.addf %11, %15 : vector<16x128xf32>
    %c1 = arith.constant 1 : index
    %c0_13 = arith.constant 0 : index
    %c0_14 = arith.constant 0 : index
    %17 = vector.load %arg3[%c1, %c0_13, %c0_14] : memref<3x16x16xbf16, #tpu.memory_space<vmem>>, vector<1x16x16xbf16>
    %18 = vector.shape_cast %17 : vector<1x16x16xbf16> to vector<16x16xbf16>
    %c0_15 = arith.constant 0 : index
    %c126 = arith.constant 126 : index
    %19 = vector.load %arg10[%c0_15, %c126] : memref<16x256xbf16, #tpu.memory_space<vmem>>, vector<16x128xbf16>
    %cst_16 = arith.constant dense<0.000000e+00> : vector<16x128xf32>
    %20 = tpu.matmul %18, %19, %cst_16 {dimension_numbers = #tpu.dot_dimension_numbers<[1], [0], [0], [1], [0, 0, 1, 1], [], []>} : vector<16x16xbf16>, vector<16x128xbf16>, vector<16x128xf32> -> vector<16x128xf32>
    %21 = arith.addf %16, %20 : vector<16x128xf32>
    %c0_17 = arith.constant 0 : index
    %c0_18 = arith.constant 0 : index
    %22 = vector.load %arg4[%c0_17, %c0_18] : memref<16x1xf32, #tpu.memory_space<vmem>>, vector<16x1xf32>
    %23 = vector.broadcast %22 : vector<16x1xf32> to vector<16x128xf32>
    %24 = arith.addf %21, %23 : vector<16x128xf32>
    %cst_19 = arith.constant 0.000000e+00 : f32
    %25 = vector.broadcast %cst_19 : f32 to vector<16x128xf32>
    %26 = arith.maximumf %24, %25 : vector<16x128xf32>
    %27 = arith.truncf %26 : vector<16x128xf32> to vector<16x128xbf16>
    %c0_20 = arith.constant 0 : index
    %c128_21 = arith.constant 128 : index
    %28 = vector.load %arg11[%c0_20, %c128_21] : memref<16x256xbf16, #tpu.memory_space<vmem>>, vector<16x128xbf16>
    tpu.vector_store %arg11[%c0_20, %c128_21], %27 {strides = array<i32>} : memref<16x256xbf16, #tpu.memory_space<vmem>>, vector<16x128xbf16>,
    %c2_22 = arith.constant 2 : index
    %c0_23 = arith.constant 0 : index
    %c0_24 = arith.constant 0 : index
    %29 = vector.load %arg5[%c2_22, %c0_23, %c0_24] : memref<3x16x16xbf16, #tpu.memory_space<vmem>>, vector<1x16x16xbf16>
    %30 = vector.shape_cast %29 : vector<1x16x16xbf16> to vector<16x16xbf16>
    %cst_25 = arith.constant dense<0.000000e+00> : vector<16x128xf32>
    %31 = tpu.matmul %30, %27, %cst_25 {dimension_numbers = #tpu.dot_dimension_numbers<[1], [0], [0], [1], [0, 0, 1, 1], [], []>} : vector<16x16xbf16>, vector<16x128xbf16>, vector<16x128xf32> -> vector<16x128xf32>
    %c0_26 = arith.constant 0 : index
    %c0_27 = arith.constant 0 : index
    %c0_28 = arith.constant 0 : index
    %32 = vector.load %arg5[%c0_26, %c0_27, %c0_28] : memref<3x16x16xbf16, #tpu.memory_space<vmem>>, vector<1x16x16xbf16>
    %33 = vector.shape_cast %32 : vector<1x16x16xbf16> to vector<16x16xbf16>
    %c0_29 = arith.constant 0 : index
    %c124_30 = arith.constant 124 : index
    %34 = vector.load %arg11[%c0_29, %c124_30] : memref<16x256xbf16, #tpu.memory_space<vmem>>, vector<16x128xbf16>
    %cst_31 = arith.constant dense<0.000000e+00> : vector<16x128xf32>
    %35 = tpu.matmul %33, %34, %cst_31 {dimension_numbers = #tpu.dot_dimension_numbers<[1], [0], [0], [1], [0, 0, 1, 1], [], []>} : vector<16x16xbf16>, vector<16x128xbf16>, vector<16x128xf32> -> vector<16x128xf32>
    %36 = arith.addf %31, %35 : vector<16x128xf32>
    %c1_32 = arith.constant 1 : index
    %c0_33 = arith.constant 0 : index
    %c0_34 = arith.constant 0 : index
    %37 = vector.load %arg5[%c1_32, %c0_33, %c0_34] : memref<3x16x16xbf16, #tpu.memory_space<vmem>>, vector<1x16x16xbf16>
    %38 = vector.shape_cast %37 : vector<1x16x16xbf16> to vector<16x16xbf16>
    %c0_35 = arith.constant 0 : index
    %c126_36 = arith.constant 126 : index
    %39 = vector.load %arg11[%c0_35, %c126_36] : memref<16x256xbf16, #tpu.memory_space<vmem>>, vector<16x128xbf16>
    %cst_37 = arith.constant dense<0.000000e+00> : vector<16x128xf32>
    %40 = tpu.matmul %38, %39, %cst_37 {dimension_numbers = #tpu.dot_dimension_numbers<[1], [0], [0], [1], [0, 0, 1, 1], [], []>} : vector<16x16xbf16>, vector<16x128xbf16>, vector<16x128xf32> -> vector<16x128xf32>
    %41 = arith.addf %36, %40 : vector<16x128xf32>
    %c0_38 = arith.constant 0 : index
    %c0_39 = arith.constant 0 : index
    %42 = vector.load %arg6[%c0_38, %c0_39] : memref<16x1xf32, #tpu.memory_space<vmem>>, vector<16x1xf32>
    %43 = vector.broadcast %42 : vector<16x1xf32> to vector<16x128xf32>
    %44 = arith.addf %41, %43 : vector<16x128xf32>
    %cst_40 = arith.constant 0.000000e+00 : f32
    %45 = vector.broadcast %cst_40 : f32 to vector<16x128xf32>
    %46 = arith.maximumf %44, %45 : vector<16x128xf32>
    %c0_41 = arith.constant 0 : index
    %c0_42 = arith.constant 0 : index
    %47 = vector.load %arg7[%c0_41, %c0_42] : memref<16x16xbf16, #tpu.memory_space<vmem>>, vector<16x16xbf16>
    %cst_43 = arith.constant dense<0.000000e+00> : vector<16x128xf32>
    %48 = tpu.matmul %47, %1, %cst_43 {dimension_numbers = #tpu.dot_dimension_numbers<[1], [0], [0], [1], [0, 0, 1, 1], [], []>} : vector<16x16xbf16>, vector<16x128xbf16>, vector<16x128xf32> -> vector<16x128xf32>
    %c0_44 = arith.constant 0 : index
    %c0_45 = arith.constant 0 : index
    %49 = vector.load %arg8[%c0_44, %c0_45] : memref<16x1xf32, #tpu.memory_space<vmem>>, vector<16x1xf32>
    %50 = vector.broadcast %49 : vector<16x1xf32> to vector<16x128xf32>
    %51 = arith.addf %48, %50 : vector<16x128xf32>
    %52 = arith.addf %46, %51 : vector<16x128xf32>
    %cst_46 = arith.constant 0.000000e+00 : f32
    %53 = vector.broadcast %cst_46 : f32 to vector<16x128xf32>
    %54 = arith.maximumf %52, %53 : vector<16x128xf32>
    %55 = arith.truncf %54 : vector<16x128xf32> to vector<16x128xbf16>
    %c0_47 = arith.constant 0 : index
    %c0_48 = arith.constant 0 : index
    %c0_49 = arith.constant 0 : index
    %56 = vector.load %arg9[%c0_47, %c0_48, %c0_49] : memref<1x16x128xbf16, #tpu.memory_space<vmem>>, vector<1x16x128xbf16>
    %57 = vector.shape_cast %56 : vector<1x16x128xbf16> to vector<16x128xbf16>
    %58 = vector.shape_cast %55 : vector<16x128xbf16> to vector<1x16x128xbf16>
    tpu.vector_store %arg9[%c0_47, %c0_48, %c0_49], %58 {strides = array<i32>} : memref<1x16x128xbf16, #tpu.memory_space<vmem>>, vector<1x16x128xbf16>,
    return
  }
  func.func @transform_0(%arg0: i32, %arg1: i32) -> (i32, i32, i32) {
    %c0_i32 = arith.constant 0 : i32
    %c0_i32_0 = arith.constant 0 : i32
    return %arg0, %c0_i32, %arg1 : i32, i32, i32
  }
  func.func @transform_1(%arg0: i32, %arg1: i32) -> (i32, i32, i32) {
    %c0_i32 = arith.constant 0 : i32
    %c0_i32_0 = arith.constant 0 : i32
    %c0_i32_1 = arith.constant 0 : i32
    %c0_i32_2 = arith.constant 0 : i32
    return %c0_i32, %c0_i32_0, %c0_i32_1 : i32, i32, i32
  }
  func.func @transform_2(%arg0: i32, %arg1: i32) -> (i32, i32) {
    %c0_i32 = arith.constant 0 : i32
    %c0_i32_0 = arith.constant 0 : i32
    %c0_i32_1 = arith.constant 0 : i32
    return %c0_i32, %c0_i32_0 : i32, i32
  }
  func.func @transform_3(%arg0: i32, %arg1: i32) -> (i32, i32, i32) {
    %c0_i32 = arith.constant 0 : i32
    %c0_i32_0 = arith.constant 0 : i32
    %c0_i32_1 = arith.constant 0 : i32
    %c0_i32_2 = arith.constant 0 : i32
    return %c0_i32, %c0_i32_0, %c0_i32_1 : i32, i32, i32
  }
  func.func @transform_4(%arg0: i32, %arg1: i32) -> (i32, i32) {
    %c0_i32 = arith.constant 0 : i32
    %c0_i32_0 = arith.constant 0 : i32
    %c0_i32_1 = arith.constant 0 : i32
    return %c0_i32, %c0_i32_0 : i32, i32
  }
  func.func @transform_5(%arg0: i32, %arg1: i32) -> (i32, i32) {
    %c0_i32 = arith.constant 0 : i32
    %c0_i32_0 = arith.constant 0 : i32
    %c0_i32_1 = arith.constant 0 : i32
    return %c0_i32, %c0_i32_0 : i32, i32
  }
  func.func @transform_6(%arg0: i32, %arg1: i32) -> (i32, i32) {
    %c0_i32 = arith.constant 0 : i32
    %c0_i32_0 = arith.constant 0 : i32
    %c0_i32_1 = arith.constant 0 : i32
    return %c0_i32, %c0_i32_0 : i32, i32
  }
  func.func @transform_7(%arg0: i32, %arg1: i32) -> (i32, i32, i32) {
    %c0_i32 = arith.constant 0 : i32
    %c0_i32_0 = arith.constant 0 : i32
    return %arg0, %c0_i32, %arg1 : i32, i32, i32
  }
}

</mosaic_0001>

<bundles_post_ra>
// kernel: tpu_custom_call.1
= control target key start
LH: loop header
LB: loop body
LE: loop exit
PB: predicated region body
PF: predicated region fallthrough
CT: control target
= control target key end

     0   :  { %s1699_s0 = inlined_call_operand.vmem [shape: bf16[2,16,384], index: 0, kind: input, shape index: {}]   ;;  %s1700_s1 = inlined_call_operand.hbm [shape: bf16[3,16,16], index: 1, kind: input, shape index: {}]   ;;  %s1701_s2 = inlined_call_operand.vmem [shape: f32[16,1], index: 2, kind: input, shape index: {}]   ;;  %s1702_s3 = inlined_call_operand.hbm [shape: bf16[3,16,16], index: 3, kind: input, shape index: {}]   ;;  %s1703_s4 = inlined_call_operand.vmem [shape: f32[16,1], index: 4, kind: input, shape index: {}]   ;;  %s1704_s5 = inlined_call_operand.vmem [shape: bf16[16,16], index: 5, kind: input, shape index: {}]   ;;  %s1705_s6 = inlined_call_operand.vmem [shape: f32[16,1], index: 6, kind: input, shape index: {}]   ;;  %s1706_s7 = inlined_call_operand.hbm [shape: bf16[2,16,384], index: 7, kind: output, shape index: {}]  }
   0x1   :  { %1718 = sst [smem:[#allocation20_spill]] %s1706_s7 }
   0x2   :  { %12 = vsyncpa [#allocation6], 0 }
   0x3   :  { %13 = vsyncpa [#allocation9], 0 }
   0x4   :  { %14 = vsyncpa [#allocation7], 0 }
   0x5   :  { %16 = vsyncpa [#allocation7 + $0x1], 0  ;;  %s1401_s24 = smov 0   ;;  %s1403_s25 = smov 0  }
   0x6   :  { %s1405_s26 = smov 0   ;;  %s1407_s27 = smov 0  }
   0x7   :  { %s1409_s28 = smov 0   ;;  %s1411_s29 = smov 0  }
   0x8   :  { %s1413_s30 = smov 0   ;;  %s1415_s8 = smov 0  }
   0x9 LB: > { %1719 = sst [smem:[#allocation14_spill]] %s1318_s24  ;;  %s976_s9 = sadd.s32 4294967295, %s1346_s8   ;;  %s1346_s8 = sphi %s1415_s8, %s22_s8   ;;  %s1342_s30 = sphi %s1413_s30, %s1749_s30   ;;  %s1338_s29 = sphi %s1411_s29, %s1748_s29   ;;  %s1334_s28 = sphi %s1409_s28, %s1747_s28   ;;  %s1330_s27 = sphi %s1407_s27, %s1746_s27   ;;  %s1326_s26 = sphi %s1405_s26, %s1745_s26   ;;  %s1322_s25 = sphi %s1403_s25, %s1744_s25   ;;  %s1318_s24 = sphi %s1401_s24, %s1743_s24  }
   0xa   : > { %s977_s10 = sadd.s32 4294967294, %s1346_s8   ;;  %s31_s11 = sadd.s32 1, %s1338_s29 }
   0xb   : > { %s34_s12 = sadd.s32 1, %s1342_s30  ;;  %p32_p0 = scmp.ge.s32.totalorder %s31_s11, 3 }
   0xc   : > { %s43_s13 = sadd.s32 1, %s1326_s26  ;;  %p50_p1 = scmp.ne.s32.totalorder %s1326_s26, %s1322_s25 }
   0xd   : > { %p51_p2 = scmp.eq.s32.totalorder %s1346_s8, 0  ;;  %s1751_s11 = smov (%p32_p0, %s31_s11), 0 }
   0xe   : > { %1720 = sst [smem:[#allocation15_spill]] %s1751_s11  ;;  %s1753_s12 = smov (!%p32_p0, %s34_s12), %s1342_s30 }
   0xf   : > { %s39_s14 = ssub.s32 %s1338_s29, %s1751_s11  ;;  %p1454_p3 = por %p51_p2, %p50_p1 }
  0x10   : > { %p36_p4 = scmp.ge.s32.totalorder %s1753_s12, 2  ;;  %p208_p5 = scmp.eq.s32.totalorder %s976_s9, 5 }
  0x11   : > { %s1721_s15 = scalar_select %p1454_p3, 1, 0 }
  0x12   : > { %p213_p6 = scmp.ne.s32.totalorder %s1322_s25, %s1318_s24  ;;  %p214_p7 = scmp.eq.s32.totalorder %s977_s10, 5 }
  0x13   : > { %s1755_s12 = smov (%p36_p4, %s1753_s12), 0  ;;  %p1462_p8 = por %p208_p5, %p50_p1 }
  0x14   : > { %1722 = sst [smem:[#allocation16_spill]] %s1755_s12  ;;  %p1466_p9 = por %p214_p7, %p213_p6 }
  0x15   : > { %s1723_s16 = scalar_select %p1462_p8, 1, 0 }
  0x16   : > { %s1725_s17 = scalar_select %p1466_p9, 1, 0 }
  0x17   : > { %1724 = sst [smem:[#allocation17_spill]] %s1723_s16  ;;  %s38_s18 = ssub.s32 %s1342_s30, %s1755_s12 }
  0x18   : > { %1726 = sst [smem:[#allocation18_spill]] %s1725_s17  ;;  %p978_p10 = scmp.ge.s32.totalorder %s1346_s8, 1 }
  0x19   : > { %s40_s19 = sor.u32 %s39_s14, %s38_s18  ;;  %p221_p11 = scmp.lt.s32.totalorder %s1346_s8, 7 }
  0x1a   : > { %p41_p12 = scmp.eq.s32.totalorder %s40_s19, 0  ;;  %p1478_p0 = scmp.eq.s32.totalorder %s976_s9, 0 }
  0x1b   : > { %p1474_p13 = pnand %p978_p10, %p221_p11  ;;  %s1348_s23 = smov [#allocation5]  }
  0x1c   : > { %s1728_s21 = scalar_select %p1478_p0, 1, 0 }
  0x1d   : > { %s1727_s20 = scalar_select %p1474_p13, 1, 0 }
  0x1e   : > { %s1483_s22 = scalar_select %p41_p12, %s1326_s26, %s43_s13  }
  0x1f   : > { %p1087_p1 = pneg %p1474_p13  ;;  %s233_s10 = sshll.u32 %s1348_s23, 4  ;;  %s234_s10 = int_to_ptr.vmem [resolvable:$true] %s233_s10 }
  0x20   : > { %1729 = sst [smem:[#allocation19_spill]] %s1483_s22  ;;  %s1349_s18 = smov [#allocation8]  }
  0x21   : > { %p1489_p2 = pnand %p1478_p0, %p1087_p1  ;;  %s249_s9 = sshll.u32 %s1349_s18, 4  ;;  %s250_s9 = int_to_ptr.vmem [resolvable:$true] %s249_s9 }
  0x22   : > { %s1188_s11 = scalar_lea.hbm %s1700_s1, 384 }
  0x23   : > { %p1189_p4 = scmp.ne.s32.totalorder %s1700_s1, %s1188_s11  ;;  %p1190_p5 = pneg %p1489_p2 }
  0x24   : > { %p1195_p10 = scmp.lt.u32.totalorder %s1188_s11, %s1700_s1 }
  0x25   : > { %p1191_p6 = pnand %p1190_p5, %p1189_p4 }
  0x27   : > { %p1192_p7 = pneg %p1191_p6 }
  0x29   : > { %p1197_p11 = pnand %p1195_p10, %p1192_p7 }
  0x2b   : > { %1200 = shalt.err (!%p1197_p11)
}
  0x2c   : > { %s1201_s18 = scalar_lea.vmem %s234_s10, 384  ;;  %p1209_p8 = scmp.lt.s32.totalorder %s234_s10, %s234_s10 }
  0x2d   : > { %p1202_p12 = scmp.ne.s32.totalorder %s234_s10, %s1201_s18  ;;  %p1210_p0 = scmp.lt.s32.totalorder %s1201_s18, %s1201_s18 }
  0x2f   : > { %p1204_p1 = pnand %p1202_p12, %p1190_p5  ;;  %p1211_p13 = por %p1210_p0, %p1209_p8 }
  0x31   : > { %p1205_p9 = pneg %p1204_p1 }
  0x33   : > { %p1212_p3 = pnand %p1211_p13, %p1205_p9 }
  0x35   : > { %1215 = shalt.err (!%p1212_p3)
}
  0x36   : > { %s1350_s12 = smov 64   ;;  %s1351_s22 = smov 4  }
  0x37   : > { %1090 = dma.hbm_to_vmem [thread:$0]  (!%p1489_p2), %s1700_s1, 384, %s234_s10, [#allocation6], %s1350_s12, %s1350_s12, %s1351_s22  }
  0x38   : > { %s1216_s23 = scalar_lea.hbm %s1702_s3, 384 }
  0x39   : > { %p1217_p8 = scmp.ne.s32.totalorder %s1702_s3, %s1216_s23  ;;  %p1223_p13 = scmp.lt.u32.totalorder %s1216_s23, %s1702_s3 }
  0x3b   : > { %p1219_p3 = pnand %p1217_p8, %p1190_p5 }
  0x3d   : > { %p1220_p9 = pneg %p1219_p3 }
  0x3f   : > { %p1225_p0 = pnand %p1223_p13, %p1220_p9 }
  0x41   : > { %1228 = shalt.err (!%p1225_p0)
}
  0x42   : > { %s1229_s10 = scalar_lea.vmem %s250_s9, 384  ;;  %p1237_p10 = scmp.lt.s32.totalorder %s250_s9, %s250_s9 }
  0x43   : > { %p1230_p4 = scmp.ne.s32.totalorder %s250_s9, %s1229_s10  ;;  %p1238_p11 = scmp.lt.s32.totalorder %s1229_s10, %s1229_s10 }
  0x45   : > { %p1232_p6 = pnand %p1230_p4, %p1190_p5  ;;  %p1239_p12 = por %p1238_p11, %p1237_p10 }
  0x47   : > { %p1233_p7 = pneg %p1232_p6 }
  0x49   : > { %p1240_p1 = pnand %p1239_p12, %p1233_p7 }
  0x4b   : > { %1243 = shalt.err (!%p1240_p1)
}
  0x4c   : > { %1093 = dma.hbm_to_vmem [thread:$0]  (!%p1489_p2), %s1702_s3, 384, %s250_s9, [#allocation9], %s1350_s12, %s1350_s12, %s1351_s22  }
  0x4d   : > { %p981_p8 = scmp.ge.s32.totalorder %s1346_s8, 6 }
  0x4e   : > { %p1731_p3 = scmp.ne.s32.totalorder (!%p981_p8), %s1721_s15, 0 }
  0x4f   : > { %268 = sbr.rel (%p981_p8) target bundleno = 94 (0x5e), region = 40 }
  0x56   : > { %271 = sbr.rel (!%p1731_p3) target bundleno = 94 (0x5e), region = 44  ;;  %s273_s16 = sand.u32 (%p1731_p3), 1, %s1326_s26  }
  0x57   : > { %s1075_s11 = smul.u32 (%p1731_p3), 6, %s1342_s30  ;;  %s982_s17 = sshll.u32 (%p1731_p3), %s273_s16, 3 }
  0x58   : > { %s275_s9 = scalar_lea.vmem (%p1731_p3), [#allocation4], %s982_s17 }
  0x59   : > { %s277_s19 = sadd.s32 (%p1731_p3), %s1338_s29, %s1075_s11 }
  0x5a   : > { %s983_s13 = sshll.u32 (%p1731_p3), %s277_s19, 2 }
  0x5b   : > { %s279_s18 = scalar_lea.vmem (%p1731_p3), %s1699_s0, %s983_s13 }
  0x5c   : > { %v295_v0 = vld [vmem:[%s279_s18] sm:$0xf] (%p1731_p3)  ;;  %v297_v1 = vld [vmem:[%s279_s18 + $0xc] sm:$0xf] (%p1731_p3) }
  0x5d   : > { %296 = vst [vmem:[%s275_s9] sm:$0xf] %v295_v0  ;;  %298 = vst [vmem:[%s275_s9 + $0x4] sm:$0xf] %v297_v1 }
  0x5e PF: > { %p1732_p2 = scmp.ne.s32.totalorder %s1727_s20, 0 }
  0x5f   : > { %s331_s15 = sand.u32 (!%p1732_p2), 1, %s1322_s25   ;;  %p1733_p5 = scmp.ne.s32.totalorder (!%p1732_p2), %s1728_s21, 0 }
  0x60   : > { %328 = sbr.rel (%p1732_p2) target bundleno = 847 (0x34f), region = 85  ;;  %s1549_s12 = sshll.u32 (!%p1732_p2), %s331_s15, 3 }
  0x61   : > { %s333_s22 = scalar_lea.vmem (!%p1732_p2), [#allocation4], %s1549_s12 }
  0x67   : > { %1305 = dma.done.wait (%p1733_p5), [#allocation6], 384  }
  0x68   : > { %1307 = vsyncadd (%p1733_p5), [#allocation6], 4294966912 }
  0x69   : > { %1309 = dma.done.wait (%p1733_p5), [#allocation9], 384  }
  0x6a   : > { %1311 = vsyncadd (%p1733_p5), [#allocation9], 4294966912  ;;  %v371_v2 = vld [vmem:[%s333_s22] sm:$0xf]  ;;  %v372_v3 = vld [vmem:[%s333_s22 + $0x4] sm:$0xf] }
  0x6b   : > { %s369_s20 = scalar_lea.vmem [#allocation10], %s1549_s12  ;;  %p989_p9 = scmp.ne.s32.totalorder %s1330_s27, 0 }
  0x6c   : > { %vm377_vm0 = vcmask (!%p989_p9), 1048544   ;;  %v1352_v4 = vmov (!%p989_p9), 0  }
  0x6d   : > { %376 = sbr.rel (%p989_p9) target bundleno = 116 (0x74), region = 101  ;;  %378 = vst.msk [vmem:[#allocation2] sm:$0xff] (!%p989_p9), %vm377_vm0, %v1352_v4  ;;  %379 = vst.msk [vmem:[#allocation3] sm:$0xff] (!%p989_p9), %vm377_vm0, %v1352_v4 }
  0x74 PF: > { %p990_p13 = scmp.le.s32.totalorder %s1330_s27, 0 }
  0x75   : > { %v384_v5 = vld [vmem:[#allocation2 + $0x8] sm:$0xff] (!%p990_p13)  ;;  %vm385_vm1 = vcmask (!%p990_p13), 1048544   ;;  %v387_v6 = vld [vmem:[#allocation3 + $0x8] sm:$0xff] (!%p990_p13) }
  0x76   : > { %383 = sbr.rel (%p990_p13) target bundleno = 125 (0x7d), region = 105  ;;  %386 = vst.msk [vmem:[#allocation2] sm:$0xff] (!%p990_p13), %vm385_vm1, %v384_v5  ;;  %388 = vst.msk [vmem:[#allocation3] sm:$0xff] (!%p990_p13), %vm385_vm1, %v387_v6 }
  0x7d PF: > { %v401_v7 = vld [vmem:[#allocation2] sm:$0xff]  ;;  %v1563_v8 = vcombine.low %v371_v2, %v372_v3  ;;  %s1353_s21 = smov 4   ;;  %s1354_s10 = smov 2   ;;  %v1355_v9 = vmov 0.0   ;;  %vm1356_vm2 = vmmov 0   ;;  %vm417_vm3 = vcmask 130048  }
  0x7e   : > { %410 = vrot.lane.b32.xlu0 %v401_v7, %s1353_s21  ;;  %519 = vrot.lane.b32.xlu1 %v401_v7, %s1354_s10  ;;  %v1182_v10 = vld [vmem:[#allocation5 + $0x10] sm:$0xff]   ;;  %v573_v11 = vld [vmem:[%s1701_s2 + $0x8] sm:$0xff]  ;;  %v1357_v13 = vmov 0   ;;  %v595_v14 = vld [vmem:[#allocation3] sm:$0xff]  ;;  %vm414_vm4 = vcmask 31744   ;;  %vm523_vm5 = vcmask 15360  }
  0x7f   : > { %395 = vst [vmem:[#allocation2 + $0x8] sm:$0xff] %v1563_v8  ;;  %1033 = vmatprep.subr.bf16.mxu0 %v1355_v9  ;;  %1039 = vmatprep.subr.bf16.mxu1 %v1355_v9  ;;  %v572_v12 = vld [vmem:[%s1701_s2] sm:$0xff]  ;;  %v1181_v22 = vld [vmem:[#allocation5] sm:$0xff]   ;;  %v1183_v24 = vld [vmem:[#allocation5 + $0x8] sm:$0xff]   ;;  %s1734_s11 = sld [smem:[#allocation17_spill]]  ;;  %s871_s19 = sshll.u32 %s369_s20, 4  ;;  %s1640_s19 = int_to_ptr.vmem [resolvable:$true] %s871_s19 }
  0x80   : > { %1040 = vmatpush3.bf16.msra.mxu1 %v1563_v8  ;;  %1035 = vmatprep.mubr.msk.bf16.mxu0 %vm1356_vm2, %v1355_v9  ;;  %v763_v15 = vld [vmem:[%s1703_s4] sm:$0xff]  ;;  %v1184_v48 = vld [vmem:[#allocation8 + $0x10] sm:$0xff]   ;;  %v764_v49 = vld [vmem:[%s1703_s4 + $0x8] sm:$0xff]  ;;  %s1735_s23 = sld [smem:[#allocation20_spill]]  ;;  %s1244_s18 = scalar_lea.vmem %s1640_s19, 128 }
  0x81   : > { %1041 = vmatprep.mubr.msk.bf16.mxu1 %vm1356_vm2, %v1355_v9  ;;  %1051 = vmatprep.subr.bf16.mxu1 %v1355_v9  ;;  %v781_v16 = vld [vmem:[%s1705_s6] sm:$0xff]  ;;  %v782_v51 = vld [vmem:[%s1705_s6 + $0x8] sm:$0xff]  ;;  %v1187_v59 = vld [vmem:[#allocation8 + $0x8] sm:$0xff]   ;;  %p1245_p0 = scmp.ne.s32.totalorder %s1640_s19, %s1244_s18  ;;  %s1358_s9 = smov [#allocation10]  }
  0x82   : > { %412 = vrot.lane.b32.xlu0 %v1563_v8, %s1353_s21  ;;  %521 = vrot.lane.b32.xlu1 %v1563_v8, %s1354_s10  ;;  %v1185_v50 = vld [vmem:[%s1704_s5] sm:$0xff]   ;;  %v1186_v55 = vld [vmem:[#allocation8] sm:$0xff]   ;;  %s1248_s22 = sshll.u32 %s1358_s9, 4  ;;  %s1249_s22 = int_to_ptr.vmem [resolvable:$false] %s1248_s22 }
  0x83   : > { %1042 = vmatmul.mubr.msk.bf16.vlgmr.msra.gmra.mrb[0].mxu1 %vm417_vm3, %v1182_v10  ;;  %1180 = vset.pattern.permute.xlu1 %v1357_v13  ;;  %s1250_s7 = scalar_lea.vmem %s1249_s22, 256  ;;  %p1251_p10 = scmp.lt.s32.totalorder %s1640_s19, %s1249_s22 }
  0x84   : > { %1179 = vset.pattern.permute.xlu0 %v1357_v13  ;;  %1053 = vmatprep.mubr.msk.bf16.mxu1 %vm1356_vm2, %v1355_v9  ;;  %p1252_p11 = scmp.lt.s32.totalorder %s1250_s7, %s1244_s18 }
  0x85   : > { %p1736_p4 = scmp.ne.s32.totalorder %s1734_s11, 0 }
  0x86   : > { %581 = vperm.xlu1 %1180, %v573_v11   ;;  %576 = vperm.xlu0 %1179, %v572_v12   ;;  %p1253_p12 = por %p1252_p11, %p1251_p10 }
  0x87   : > { %p1246_p6 = pnand %p1245_p0, %p1736_p4 }
  0x89   : > { %p1247_p7 = pneg %p1246_p6 }
  0x8a   : > { %604 = vrot.lane.b32.xlu1 %v595_v14, %s1353_s21 }
  0x8b   : > { %p1254_p1 = pnand %p1253_p12, %p1247_p7 }
  0x8e   : > { %711 = vrot.lane.b32.xlu1 %v595_v14, %s1354_s10 }
  0x92   : > { %767 = vperm.xlu1 %1180, %v763_v15  }
  0x96   : > { %785 = vperm.xlu1 %1180, %v781_v16  }
  0xf0   : > { %v411_v17 = vpop.permute.xlu0 %410  ;;  %v520_v18 = vpop.permute.xlu1 %519 }
  0xf4   : > { %v413_v19 = vpop.permute.xlu0 %412  ;;  %v522_v20 = vpop.permute.xlu1 %521 }
  0xf5   : > { %v415_v21 = vsel %vm414_vm4, %v411_v17, %v413_v19  ;;  %v524_v23 = vsel %vm523_vm5, %v520_v18, %v522_v20 }
  0xf6   : > { %1034 = vmatpush3.bf16.msra.mxu0 %v415_v21 }
  0xf7   : > { %1045 = vmatprep.subr.bf16.mxu0 %v1355_v9 }
  0xf9   : > { %1036 = vmatmul.mubr.msk.bf16.vlgmr.msra.gmra.mrb[0].mxu0 %vm417_vm3, %v1181_v22 }
  0xfa   : > { %1046 = vmatpush3.bf16.msra.mxu0 %v524_v23  ;;  %1047 = vmatprep.mubr.msk.bf16.mxu0 %vm1356_vm2, %v1355_v9 }
  0xfb   : > { %1057 = vmatprep.subr.bf16.mxu0 %v1355_v9 }
 0x101   : > { %1048 = vmatmul.mubr.msk.bf16.vlgmr.msra.gmra.mrb[4].mxu0 %vm417_vm3, %v1183_v24 }
 0x102   : > { %1059 = vmatprep.mubr.msk.bf16.mxu0 %vm1356_vm2, %v1355_v9 }
 0x105   : > { %v577_v36 = vpop.permute.xlu0 %576  ;;  %v582_v43 = vpop.permute.xlu1 %581 }
 0x109   : > { %v605_v52 = vpop.permute.xlu1 %604 }
 0x10d   : > { %v712_v56 = vpop.permute.xlu1 %711 }
 0x156   : > { %v504_v25 = vpop.f32.mrb[0].mxu1 }
 0x157   : > { %v1043_v26 = vpop.f32.mrb[1].mxu1 }
 0x158   : > { %v507_v27 = vpop.f32.mrb[2].mxu1 }
 0x159   : > { %v1044_v28 = vpop.f32.mrb[3].mxu1 }
 0x1cc   : > { %v455_v29 = vpop.f32.mrb[0].mxu0 }
 0x1cd   : > { %v505_v30 = vadd.f32 %v504_v25, %v455_v29  ;;  %v1037_v31 = vpop.f32.mrb[1].mxu0 }
 0x1ce   : > { %v458_v32 = vpop.f32.mrb[2].mxu0 }
 0x1cf   : > { %v508_v33 = vadd.f32 %v507_v27, %v458_v32  ;;  %v1038_v34 = vpop.f32.mrb[3].mxu0 }
 0x1d4   : > { %v563_v35 = vpop.f32.mrb[4].mxu0 }
 0x1d5   : > { %v570_v37 = vadd.f32 %v563_v35, %v505_v30  ;;  %v1049_v38 = vpop.f32.mrb[5].mxu0 }
 0x1d6   : > { %v566_v39 = vpop.f32.mrb[6].mxu0 }
 0x1d7   : > { %v571_v40 = vadd.f32 %v566_v39, %v508_v33  ;;  %v584_v41 = vadd.f32 %v577_v36, %v570_v37  ;;  %v1050_v42 = vpop.f32.mrb[7].mxu0 }
 0x1d9   : > { %v585_v44 = vadd.f32 %v582_v43, %v571_v40  ;;  %v586_v46 = vmax.f32 %v584_v41, 0.0 }
 0x1db   : > { %v587_v45 = vmax.f32 %v585_v44, 0.0 }
 0x1dd   : > { %v588_v47 = vpack.c.bf16 %v587_v45, %v586_v46 }
 0x1df   : > { %589 = vst [vmem:[#allocation3 + $0x8] sm:$0xff] %v588_v47  ;;  %1058 = vmatpush3.bf16.msra.mxu0 %v588_v47  ;;  %606 = vrot.lane.b32.xlu0 %v588_v47, %s1353_s21 }
 0x1e0   : > { %1069 = vmatprep.subr.bf16.mxu0 %v1355_v9 }
 0x1e2   : > { %1060 = vmatmul.mubr.msk.bf16.vlgmr.msra.gmra.mrb[8].mxu0 %vm417_vm3, %v1184_v48 }
 0x1e3   : > { %1070 = vmatpush3.bf16.msra.mxu0 %v1563_v8  ;;  %1071 = vmatprep.mubr.msk.bf16.mxu0 %vm1356_vm2, %v1355_v9 }
 0x1e4   : > { %713 = vrot.lane.b32.xlu0 %v588_v47, %s1354_s10  ;;  %s1076_s10 = smul.u32 6, %s1334_s28 }
 0x1e6   : > { %s868_s16 = sadd.s32 %s1330_s27, %s1076_s10  ;;  %s1646_s27 = scalar_lea.sflag [#allocation7], %s331_s15 }
 0x1e7   : > { %s1009_s17 = sshll.u32 %s868_s16, 6 }
 0x1e8   : > { %772 = vperm.xlu0 %1179, %v764_v49   ;;  %s1638_s14 = scalar_lea.hbm %s1735_s23, %s1009_s17 }
 0x1ea   : > { %1072 = vmatmul.mubr.msk.bf16.vlgmr.msra.gmra.mrb[12].mxu0 %vm417_vm3, %v1185_v50 }
 0x1ec   : > { %790 = vperm.xlu0 %1179, %v782_v51  }
 0x251   : > { %v607_v53 = vpop.permute.xlu0 %606 }
 0x252   : > { %v608_v54 = vsel %vm414_vm4, %v605_v52, %v607_v53 }
 0x253   : > { %1052 = vmatpush3.bf16.msra.mxu1 %v608_v54 }
 0x254   : > { %1063 = vmatprep.subr.bf16.mxu1 %v1355_v9 }
 0x256   : > { %v714_v57 = vpop.permute.xlu0 %713  ;;  %1054 = vmatmul.mubr.msk.bf16.vlgmr.msra.gmra.mrb[4].mxu1 %vm417_vm3, %v1186_v55 }
 0x257   : > { %v715_v58 = vsel %vm523_vm5, %v712_v56, %v714_v57  ;;  %1065 = vmatprep.mubr.msk.bf16.mxu1 %vm1356_vm2, %v1355_v9  ;;  %v768_v9 = vpop.permute.xlu1 %767 }
 0x258   : > { %1064 = vmatpush3.bf16.msra.mxu1 %v715_v58 }
 0x25b   : > { %v786_v19 = vpop.permute.xlu1 %785 }
 0x25e   : > { %1066 = vmatmul.mubr.msk.bf16.vlgmr.msra.gmra.mrb[8].mxu1 %vm417_vm3, %v1187_v59 }
 0x267   : > { %v773_v11 = vpop.permute.xlu0 %772 }
 0x26b   : > { %v791_v23 = vpop.permute.xlu0 %790 }
 0x2b5   : > { %v696_v60 = vpop.f32.mrb[8].mxu0 }
 0x2b6   : > { %v1061_v61 = vpop.f32.mrb[9].mxu0 }
 0x2b7   : > { %v699_v62 = vpop.f32.mrb[10].mxu0 }
 0x2b8   : > { %v1062_v63 = vpop.f32.mrb[11].mxu0 }
 0x2bd   : > { %v835_v0 = vpop.f32.mrb[12].mxu0 }
 0x2be   : > { %v1073_v1 = vpop.f32.mrb[13].mxu0  ;;  %v836_v20 = vadd.f32 %v835_v0, %v786_v19 }
 0x2bf   : > { %v838_v2 = vpop.f32.mrb[14].mxu0 }
 0x2c0   : > { %v1074_v3 = vpop.f32.mrb[15].mxu0  ;;  %v839_v24 = vadd.f32 %v838_v2, %v791_v23 }
 0x329   : > { %v647_v4 = vpop.f32.mrb[4].mxu1 }
 0x32a   : > { %v697_v5 = vadd.f32 %v696_v60, %v647_v4  ;;  %v1055_v6 = vpop.f32.mrb[5].mxu1 }
 0x32b   : > { %v650_v7 = vpop.f32.mrb[6].mxu1 }
 0x32c   : > { %v700_v8 = vadd.f32 %v699_v62, %v650_v7  ;;  %v1056_v10 = vpop.f32.mrb[7].mxu1 }
 0x331   : > { %v754_v12 = vpop.f32.mrb[8].mxu1 }
 0x332   : > { %v761_v13 = vadd.f32 %v754_v12, %v697_v5  ;;  %v1067_v14 = vpop.f32.mrb[9].mxu1 }
 0x333   : > { %v757_v15 = vpop.f32.mrb[10].mxu1 }
 0x334   : > { %v775_v16 = vadd.f32 %v768_v9, %v761_v13  ;;  %v762_v17 = vadd.f32 %v757_v15, %v700_v8  ;;  %v1068_v18 = vpop.f32.mrb[11].mxu1 }
 0x336   : > { %v777_v21 = vmax.f32 %v775_v16, 0.0  ;;  %v776_v22 = vadd.f32 %v773_v11, %v762_v17 }
 0x338   : > { %v842_v25 = vadd.f32 %v836_v20, %v777_v21  ;;  %v778_v26 = vmax.f32 %v776_v22, 0.0 }
 0x33a   : > { %v843_v27 = vadd.f32 %v839_v24, %v778_v26  ;;  %v844_v28 = vmax.f32 %v842_v25, 0.0 }
 0x33c   : > { %v845_v29 = vmax.f32 %v843_v27, 0.0 }
 0x33e   : > { %v1017_v30 = vpack.c.bf16 %v845_v29, %v844_v28 }
 0x340   : > { %1018 = vst [vmem:[%s369_s20] sm:$0xff] %v1017_v30  }
 0x341   : > { %1257 = shalt.err (!%p1254_p1)
}
 0x342   : > { %s1258_s15 = scalar_lea.hbm %s1638_s14, 128  ;;  %s1262_s24 = scalar_lea.hbm %s1735_s23, 768 }
 0x343   : > { %p1259_p8 = scmp.ne.s32.totalorder %s1638_s14, %s1258_s15  ;;  %p1263_p5 = scmp.lt.u32.totalorder %s1638_s14, %s1735_s23 }
 0x344   : > { %p1264_p9 = scmp.lt.u32.totalorder %s1262_s24, %s1258_s15  ;;  %p1266_p0 = scmp.lt.u32.totalorder %s1258_s15, %s1638_s14 }
 0x345   : > { %p1260_p3 = pnand %p1259_p8, %p1736_p4 }
 0x346   : > { %p1265_p13 = por %p1264_p9, %p1263_p5 }
 0x347   : > { %p1261_p2 = pneg %p1260_p3 }
 0x348   : > { %p1267_p6 = por %p1266_p0, %p1265_p13 }
 0x34a   : > { %p1268_p7 = pnand %p1267_p6, %p1261_p2 }
 0x34c   : > { %1271 = shalt.err (!%p1268_p7)
}
 0x34d   : > { %s1359_s17 = smov 64   ;;  %s1360_s28 = smov 192  }
 0x34e   : > { %1085 = dma.vmem_to_hbm [thread:$0]  (%p1736_p4), %s1640_s19, 128, %s1638_s14, %s1646_s27, %s1359_s17, %s1360_s28, %s1353_s21  }
 0x34f PF: > { %s1737_s13 = sld [smem:[#allocation14_spill]]  ;;  %s1738_s18 = sld [smem:[#allocation18_spill]] }
 0x350   : > { %p1102_p10 = scmp.ge.s32.totalorder %s1346_s8, 2 }
 0x355   : > { %s886_s9 = sand.u32 1, %s1737_s13   ;;  %p1739_p11 = scmp.ne.s32.totalorder %s1738_s18, 0 }
 0x356   : > { %s887_s22 = scalar_lea.sflag [#allocation7], %s886_s9 }
 0x357   : > { %p1095_p12 = pnand %p1102_p10, %p1739_p11 }
 0x359   : > { %1313 = dma.done.wait (!%p1095_p12), %s887_s22, 128  }
 0x35a   : > { %1315 = vsyncadd (!%p1095_p12), %s887_s22, 4294967168  ;;  %s22_s8 = sadd.s32 1, %s1346_s8   ;;  %s1740_s7 = sld [smem:[#allocation19_spill]] }
 0x35b   : > { %p19_p1 = scmp.ge.s32.totalorder %s22_s8, 8   ;;  %s1741_s21 = sld [smem:[#allocation15_spill]] }
 0x35c   : > { %s1742_s11 = sld [smem:[#allocation16_spill]]  ;;  %s1743_s24 = smov %s1322_s25 }
 0x35d   : > { %s1744_s25 = smov %s1326_s26  ;;  %s1746_s27 = smov %s1338_s29 }
 0x35e   : > { %s1747_s28 = smov %s1342_s30  ;;  %21 = sbr.rel (!%p19_p1) target bundleno = 9 (0x9), region = 150 }
 0x360   : > { %s1745_s26 = smov %s1740_s7 }
 0x361   : > { %s1748_s29 = smov %s1741_s21 }
 0x362   : > { %s1749_s30 = smov %s1742_s11 }
 0x365   :  { %892 = vsyncpa [#allocation6], 1 }
 0x366   :  { %894 = vsyncpa [#allocation6 + $0x1], 1 }
 0x367   :  { %895 = vsyncpa [#allocation9], 1 }
 0x368   :  { %896 = vsyncpa [#allocation7], 1 }
 0x369   :  { %898 = vsyncpa [#allocation7 + $0x1], 1 }

</bundles_post_ra>
